<compile_context>
chip_gen: v6e
topology: v6e:2x2x1
jax: 0.10.0
libtpu: 0.0.40
codegen_flags: <defaults>
</compile_context>

<pallas_src>
import functools

import jax
import jax.numpy as jnp
from jax import lax
from jax.experimental import pallas as pl
from jax.experimental.pallas import tpu as pltpu

_MAX_DMA_SLOTS = 8  # max in-flight row DMAs per grid step


def prepare_rel_pos_table(rel_pos_emb: jax.Array) -> jax.Array:
    """One-time (parameter-init-time) transform: reverse the table along axis 0.

    With rev[t] = emb[table_len - 1 - t], output row i of the forward becomes a
    single contiguous slice rev[max_len-1-i : max_len-1-i + seq_len, :].
    Do this once when the parameter is created/updated, not per forward call.
    """
    return jnp.flip(rel_pos_emb, axis=0)


def _rel_pos_kernel(rev_ref, out_hbm_ref, sem, *, max_len: int, seq_len: int,
                    rows_per_block: int, n_slots: int):
    """One grid step writes `rows_per_block` query rows of the output, each via
    a direct table-VMEM -> HBM DMA (no VMEM staging of the output)."""
    blk = pl.program_id(0)
    row0 = blk * rows_per_block          # first global query row of this block
    base = max_len - 1 - row0            # table slice start for local row 0

    def row_copy(r):
        # out[row0 + r, :, :] = rev[base - r : base - r + seq_len, :]
        return pltpu.make_async_copy(
            rev_ref.at[pl.ds(base - r, seq_len), :],
            out_hbm_ref.at[row0 + r],
            sem.at[r % n_slots],
        )

    n_warm = min(n_slots, rows_per_block)

    # Warm-up: fill the DMA ring (short, compile-time unrolled).
    for r in range(n_warm):
        row_copy(r).start()

    # Steady state: recycle slots with a plain fori_loop (scalar work only).
    if rows_per_block > n_warm:
        def steady(r, carry):
            row_copy(r - n_warm).wait()   # free this slot
            row_copy(r).start()
            return carry
        lax.fori_loop(n_warm, rows_per_block, steady, 0)

    # Drain: wait for the last n_warm copies before the grid step ends.
    for k in range(n_warm):
        row_copy(rows_per_block - n_warm + k).wait()


def _pick_rows_per_block(seq_len: int) -> int:
    """Largest divisor of seq_len that still leaves >= 2 grid blocks (so v7x's
    two TensorCores both get work) and is capped at 128 rows per block (keeps
    the ~0.35 us per-grid-step overhead negligible)."""
    if seq_len <= 1:
        return 1
    best = 1
    for cand in range(2, min(seq_len // 2, 128) + 1):
        if seq_len % cand == 0:
            best = cand
    return best


def relative_positional_encoding(rev_emb: jax.Array, seq_len: int, max_len: int):
    """Pallas forward of RelativePositionalEncoding.forward(seq_len).

    `rev_emb` is the prepared (flipped) table from `prepare_rel_pos_table`.
    """
    table_len, d_model = rev_emb.shape
    assert table_len == 2 * max_len - 1
    assert 0 < seq_len <= max_len

    rows_per_block = _pick_rows_per_block(seq_len)
    assert seq_len % rows_per_block == 0
    n_slots = min(_MAX_DMA_SLOTS, rows_per_block)

    # VMEM footprint is just the table (double-buffered by the BlockSpec
    # pipeline, though the constant index_map means it is fetched only once)
    # plus semaphores/headroom.  The output never touches VMEM.
    itemsize = jnp.dtype(rev_emb.dtype).itemsize
    table_bytes = table_len * d_model * itemsize
    vmem_limit = int(min(max(2 * table_bytes + (4 << 20), 16 << 20), 64 << 20))

    kernel = functools.partial(
        _rel_pos_kernel, max_len=max_len, seq_len=seq_len,
        rows_per_block=rows_per_block, n_slots=n_slots)

    return pl.pallas_call(
        kernel,
        out_shape=jax.ShapeDtypeStruct((seq_len, seq_len, d_model), rev_emb.dtype),
        grid=(seq_len // rows_per_block,),
        # Whole (small) flipped table VMEM-resident at every grid step.
        in_specs=[pl.BlockSpec((table_len, d_model), lambda i: (0, 0))],
        # Raw HBM output ref: rows are written by direct VMEM->HBM DMAs.
        out_specs=pl.BlockSpec(memory_space=pl.ANY),
        scratch_shapes=[pltpu.SemaphoreType.DMA((n_slots,))],
        compiler_params=pltpu.CompilerParams(
            dimension_semantics=("parallel",),   # shards row-blocks across v7x's 2 TCs
            vmem_limit_bytes=vmem_limit,
        ),
    )(rev_emb)


def _reference(rel_pos_emb, seq_len, max_len):
    """Pure-JAX reference of the PyTorch forward."""
    positions = jnp.arange(seq_len)
    rel_pos = positions[:, None] - positions[None, :] + max_len - 1
    return rel_pos_emb[rel_pos]


if __name__ == "__main__":
    key = jax.random.PRNGKey(0)

    # Small, self-consistent shapes.  d_model=128 keeps everything lane-dense.
    # Config 0: all row DMAs fit in the warm-up ring (simple path).
    # Config 1: seq_len == max_len and rows_per_block > 8, exercising the
    #           steady-state fori_loop DMA ring and the table-boundary indices.
    configs = [
        (128, 16, 8),    # (d_model, max_len, seq_len)
        (128, 32, 32),
    ]

    for idx, (d_model, max_len, seq_len) in enumerate(configs):
        k = jax.random.fold_in(key, idx)
        # Deterministic parameter (PyTorch inits to zeros; use a normal so the
        # gather result is non-trivial).
        rel_pos_emb = jax.random.normal(
            k, (2 * max_len - 1, d_model), dtype=jnp.float32)

        rev_emb = prepare_rel_pos_table(rel_pos_emb)   # one-time, init-time
        out = relative_positional_encoding(rev_emb, seq_len, max_len)
        out = jax.block_until_ready(out)

        ref = _reference(rel_pos_emb, seq_len, max_len)
        assert out.shape == (seq_len, seq_len, d_model), out.shape
        assert out.dtype == rel_pos_emb.dtype
        assert jnp.array_equal(out, ref), f"Pallas output mismatch (config {idx})"

    print("KERNEL_OK")
</pallas_src>

<mosaic_0001>
module attributes {stable_mosaic.version = 11 : i64} {
  func.func @_rel_pos_kernel(%arg0: i32, %arg1: memref<31x128xf32, #tpu.memory_space<vmem>>, %arg2: memref<8x8x128xf32, #tpu.memory_space<any>>, %arg3: memref<4x!tpu.dma_semaphore, #tpu.memory_space<semaphore_mem>>) attributes {dimension_semantics = [#tpu.dimension_semantics<parallel>], iteration_bounds = array<i64: 2>, scalar_prefetch = 0 : i64, scratch_operands = 1 : i64, tpu.core_type = #tpu.core_type<tc>, window_params = [{pipeline_mode = #tpu.pipeline_mode<synchronous>, transform_indices = @transform_0, window_bounds = array<i64: 31, 128>}, {}]} {
    %c4_i32 = arith.constant 4 : i32
    %0 = arith.muli %arg0, %c4_i32 : i32
    %c15_i32 = arith.constant 15 : i32
    %1 = arith.subi %c15_i32, %0 : i32
    %c0_i32 = arith.constant 0 : i32
    %2 = arith.subi %1, %c0_i32 : i32
    %c0_i32_0 = arith.constant 0 : i32
    %3 = arith.addi %0, %c0_i32_0 : i32
    %c0_i32_1 = arith.constant 0 : i32
    %c0_i32_2 = arith.constant 0 : i32
    %4 = tpu.memref_slice %arg1[%2, %c0_i32_2] : memref<31x128xf32, #tpu.memory_space<vmem>> -> memref<8x128xf32, #tpu.memory_space<vmem>>
    %c0_i32_3 = arith.constant 0 : i32
    %c0_i32_4 = arith.constant 0 : i32
    %5 = tpu.memref_slice %arg2[%3, %c0_i32_3, %c0_i32_4] : memref<8x8x128xf32, #tpu.memory_space<any>> -> memref<1x8x128xf32, #tpu.memory_space<any>>
    %6 = tpu.memref_squeeze %5 : memref<1x8x128xf32, #tpu.memory_space<any>> -> memref<8x128xf32, #tpu.memory_space<any>>
    %7 = tpu.memref_slice %arg3[%c0_i32_1] : memref<4x!tpu.dma_semaphore, #tpu.memory_space<semaphore_mem>> -> memref<1x!tpu.dma_semaphore, #tpu.memory_space<semaphore_mem>>
    %8 = tpu.memref_squeeze %7 : memref<1x!tpu.dma_semaphore, #tpu.memory_space<semaphore_mem>> -> memref<!tpu.dma_semaphore, #tpu.memory_space<semaphore_mem>>
    tpu.enqueue_dma source(%4 : memref<8x128xf32, #tpu.memory_space<vmem>>) target(%6 : memref<8x128xf32, #tpu.memory_space<any>>) target_semaphore(%8 : memref<!tpu.dma_semaphore, #tpu.memory_space<semaphore_mem>>)
    %c1_i32 = arith.constant 1 : i32
    %9 = arith.subi %1, %c1_i32 : i32
    %c1_i32_5 = arith.constant 1 : i32
    %10 = arith.addi %0, %c1_i32_5 : i32
    %c1_i32_6 = arith.constant 1 : i32
    %c0_i32_7 = arith.constant 0 : i32
    %11 = tpu.memref_slice %arg1[%9, %c0_i32_7] : memref<31x128xf32, #tpu.memory_space<vmem>> -> memref<8x128xf32, #tpu.memory_space<vmem>>
    %c0_i32_8 = arith.constant 0 : i32
    %c0_i32_9 = arith.constant 0 : i32
    %12 = tpu.memref_slice %arg2[%10, %c0_i32_8, %c0_i32_9] : memref<8x8x128xf32, #tpu.memory_space<any>> -> memref<1x8x128xf32, #tpu.memory_space<any>>
    %13 = tpu.memref_squeeze %12 : memref<1x8x128xf32, #tpu.memory_space<any>> -> memref<8x128xf32, #tpu.memory_space<any>>
    %14 = tpu.memref_slice %arg3[%c1_i32_6] : memref<4x!tpu.dma_semaphore, #tpu.memory_space<semaphore_mem>> -> memref<1x!tpu.dma_semaphore, #tpu.memory_space<semaphore_mem>>
    %15 = tpu.memref_squeeze %14 : memref<1x!tpu.dma_semaphore, #tpu.memory_space<semaphore_mem>> -> memref<!tpu.dma_semaphore, #tpu.memory_space<semaphore_mem>>
    tpu.enqueue_dma source(%11 : memref<8x128xf32, #tpu.memory_space<vmem>>) target(%13 : memref<8x128xf32, #tpu.memory_space<any>>) target_semaphore(%15 : memref<!tpu.dma_semaphore, #tpu.memory_space<semaphore_mem>>)
    %c2_i32 = arith.constant 2 : i32
    %16 = arith.subi %1, %c2_i32 : i32
    %c2_i32_10 = arith.constant 2 : i32
    %17 = arith.addi %0, %c2_i32_10 : i32
    %c2_i32_11 = arith.constant 2 : i32
    %c0_i32_12 = arith.constant 0 : i32
    %18 = tpu.memref_slice %arg1[%16, %c0_i32_12] : memref<31x128xf32, #tpu.memory_space<vmem>> -> memref<8x128xf32, #tpu.memory_space<vmem>>
    %c0_i32_13 = arith.constant 0 : i32
    %c0_i32_14 = arith.constant 0 : i32
    %19 = tpu.memref_slice %arg2[%17, %c0_i32_13, %c0_i32_14] : memref<8x8x128xf32, #tpu.memory_space<any>> -> memref<1x8x128xf32, #tpu.memory_space<any>>
    %20 = tpu.memref_squeeze %19 : memref<1x8x128xf32, #tpu.memory_space<any>> -> memref<8x128xf32, #tpu.memory_space<any>>
    %21 = tpu.memref_slice %arg3[%c2_i32_11] : memref<4x!tpu.dma_semaphore, #tpu.memory_space<semaphore_mem>> -> memref<1x!tpu.dma_semaphore, #tpu.memory_space<semaphore_mem>>
    %22 = tpu.memref_squeeze %21 : memref<1x!tpu.dma_semaphore, #tpu.memory_space<semaphore_mem>> -> memref<!tpu.dma_semaphore, #tpu.memory_space<semaphore_mem>>
    tpu.enqueue_dma source(%18 : memref<8x128xf32, #tpu.memory_space<vmem>>) target(%20 : memref<8x128xf32, #tpu.memory_space<any>>) target_semaphore(%22 : memref<!tpu.dma_semaphore, #tpu.memory_space<semaphore_mem>>)
    %c3_i32 = arith.constant 3 : i32
    %23 = arith.subi %1, %c3_i32 : i32
    %c3_i32_15 = arith.constant 3 : i32
    %24 = arith.addi %0, %c3_i32_15 : i32
    %c3_i32_16 = arith.constant 3 : i32
    %c0_i32_17 = arith.constant 0 : i32
    %25 = tpu.memref_slice %arg1[%23, %c0_i32_17] : memref<31x128xf32, #tpu.memory_space<vmem>> -> memref<8x128xf32, #tpu.memory_space<vmem>>
    %c0_i32_18 = arith.constant 0 : i32
    %c0_i32_19 = arith.constant 0 : i32
    %26 = tpu.memref_slice %arg2[%24, %c0_i32_18, %c0_i32_19] : memref<8x8x128xf32, #tpu.memory_space<any>> -> memref<1x8x128xf32, #tpu.memory_space<any>>
    %27 = tpu.memref_squeeze %26 : memref<1x8x128xf32, #tpu.memory_space<any>> -> memref<8x128xf32, #tpu.memory_space<any>>
    %28 = tpu.memref_slice %arg3[%c3_i32_16] : memref<4x!tpu.dma_semaphore, #tpu.memory_space<semaphore_mem>> -> memref<1x!tpu.dma_semaphore, #tpu.memory_space<semaphore_mem>>
    %29 = tpu.memref_squeeze %28 : memref<1x!tpu.dma_semaphore, #tpu.memory_space<semaphore_mem>> -> memref<!tpu.dma_semaphore, #tpu.memory_space<semaphore_mem>>
    tpu.enqueue_dma source(%25 : memref<8x128xf32, #tpu.memory_space<vmem>>) target(%27 : memref<8x128xf32, #tpu.memory_space<any>>) target_semaphore(%29 : memref<!tpu.dma_semaphore, #tpu.memory_space<semaphore_mem>>)
    %c0_i32_20 = arith.constant 0 : i32
    %30 = arith.subi %1, %c0_i32_20 : i32
    %c0_i32_21 = arith.constant 0 : i32
    %31 = arith.addi %0, %c0_i32_21 : i32
    %c0_i32_22 = arith.constant 0 : i32
    %c0_i32_23 = arith.constant 0 : i32
    %32 = tpu.memref_slice %arg1[%30, %c0_i32_23] : memref<31x128xf32, #tpu.memory_space<vmem>> -> memref<8x128xf32, #tpu.memory_space<vmem>>
    %c0_i32_24 = arith.constant 0 : i32
    %c0_i32_25 = arith.constant 0 : i32
    %33 = tpu.memref_slice %arg2[%31, %c0_i32_24, %c0_i32_25] : memref<8x8x128xf32, #tpu.memory_space<any>> -> memref<1x8x128xf32, #tpu.memory_space<any>>
    %34 = tpu.memref_squeeze %33 : memref<1x8x128xf32, #tpu.memory_space<any>> -> memref<8x128xf32, #tpu.memory_space<any>>
    %35 = tpu.memref_slice %arg3[%c0_i32_22] : memref<4x!tpu.dma_semaphore, #tpu.memory_space<semaphore_mem>> -> memref<1x!tpu.dma_semaphore, #tpu.memory_space<semaphore_mem>>
    %36 = tpu.memref_squeeze %35 : memref<1x!tpu.dma_semaphore, #tpu.memory_space<semaphore_mem>> -> memref<!tpu.dma_semaphore, #tpu.memory_space<semaphore_mem>>
    tpu.wait_dma2 semaphore(%36 : memref<!tpu.dma_semaphore, #tpu.memory_space<semaphore_mem>>) src(%32 : memref<8x128xf32, #tpu.memory_space<vmem>>) dst(%34 : memref<8x128xf32, #tpu.memory_space<any>>)
    %c1_i32_26 = arith.constant 1 : i32
    %37 = arith.subi %1, %c1_i32_26 : i32
    %c1_i32_27 = arith.constant 1 : i32
    %38 = arith.addi %0, %c1_i32_27 : i32
    %c1_i32_28 = arith.constant 1 : i32
    %c0_i32_29 = arith.constant 0 : i32
    %39 = tpu.memref_slice %arg1[%37, %c0_i32_29] : memref<31x128xf32, #tpu.memory_space<vmem>> -> memref<8x128xf32, #tpu.memory_space<vmem>>
    %c0_i32_30 = arith.constant 0 : i32
    %c0_i32_31 = arith.constant 0 : i32
    %40 = tpu.memref_slice %arg2[%38, %c0_i32_30, %c0_i32_31] : memref<8x8x128xf32, #tpu.memory_space<any>> -> memref<1x8x128xf32, #tpu.memory_space<any>>
    %41 = tpu.memref_squeeze %40 : memref<1x8x128xf32, #tpu.memory_space<any>> -> memref<8x128xf32, #tpu.memory_space<any>>
    %42 = tpu.memref_slice %arg3[%c1_i32_28] : memref<4x!tpu.dma_semaphore, #tpu.memory_space<semaphore_mem>> -> memref<1x!tpu.dma_semaphore, #tpu.memory_space<semaphore_mem>>
    %43 = tpu.memref_squeeze %42 : memref<1x!tpu.dma_semaphore, #tpu.memory_space<semaphore_mem>> -> memref<!tpu.dma_semaphore, #tpu.memory_space<semaphore_mem>>
    tpu.wait_dma2 semaphore(%43 : memref<!tpu.dma_semaphore, #tpu.memory_space<semaphore_mem>>) src(%39 : memref<8x128xf32, #tpu.memory_space<vmem>>) dst(%41 : memref<8x128xf32, #tpu.memory_space<any>>)
    %c2_i32_32 = arith.constant 2 : i32
    %44 = arith.subi %1, %c2_i32_32 : i32
    %c2_i32_33 = arith.constant 2 : i32
    %45 = arith.addi %0, %c2_i32_33 : i32
    %c2_i32_34 = arith.constant 2 : i32
    %c0_i32_35 = arith.constant 0 : i32
    %46 = tpu.memref_slice %arg1[%44, %c0_i32_35] : memref<31x128xf32, #tpu.memory_space<vmem>> -> memref<8x128xf32, #tpu.memory_space<vmem>>
    %c0_i32_36 = arith.constant 0 : i32
    %c0_i32_37 = arith.constant 0 : i32
    %47 = tpu.memref_slice %arg2[%45, %c0_i32_36, %c0_i32_37] : memref<8x8x128xf32, #tpu.memory_space<any>> -> memref<1x8x128xf32, #tpu.memory_space<any>>
    %48 = tpu.memref_squeeze %47 : memref<1x8x128xf32, #tpu.memory_space<any>> -> memref<8x128xf32, #tpu.memory_space<any>>
    %49 = tpu.memref_slice %arg3[%c2_i32_34] : memref<4x!tpu.dma_semaphore, #tpu.memory_space<semaphore_mem>> -> memref<1x!tpu.dma_semaphore, #tpu.memory_space<semaphore_mem>>
    %50 = tpu.memref_squeeze %49 : memref<1x!tpu.dma_semaphore, #tpu.memory_space<semaphore_mem>> -> memref<!tpu.dma_semaphore, #tpu.memory_space<semaphore_mem>>
    tpu.wait_dma2 semaphore(%50 : memref<!tpu.dma_semaphore, #tpu.memory_space<semaphore_mem>>) src(%46 : memref<8x128xf32, #tpu.memory_space<vmem>>) dst(%48 : memref<8x128xf32, #tpu.memory_space<any>>)
    %c3_i32_38 = arith.constant 3 : i32
    %51 = arith.subi %1, %c3_i32_38 : i32
    %c3_i32_39 = arith.constant 3 : i32
    %52 = arith.addi %0, %c3_i32_39 : i32
    %c3_i32_40 = arith.constant 3 : i32
    %c0_i32_41 = arith.constant 0 : i32
    %53 = tpu.memref_slice %arg1[%51, %c0_i32_41] : memref<31x128xf32, #tpu.memory_space<vmem>> -> memref<8x128xf32, #tpu.memory_space<vmem>>
    %c0_i32_42 = arith.constant 0 : i32
    %c0_i32_43 = arith.constant 0 : i32
    %54 = tpu.memref_slice %arg2[%52, %c0_i32_42, %c0_i32_43] : memref<8x8x128xf32, #tpu.memory_space<any>> -> memref<1x8x128xf32, #tpu.memory_space<any>>
    %55 = tpu.memref_squeeze %54 : memref<1x8x128xf32, #tpu.memory_space<any>> -> memref<8x128xf32, #tpu.memory_space<any>>
    %56 = tpu.memref_slice %arg3[%c3_i32_40] : memref<4x!tpu.dma_semaphore, #tpu.memory_space<semaphore_mem>> -> memref<1x!tpu.dma_semaphore, #tpu.memory_space<semaphore_mem>>
    %57 = tpu.memref_squeeze %56 : memref<1x!tpu.dma_semaphore, #tpu.memory_space<semaphore_mem>> -> memref<!tpu.dma_semaphore, #tpu.memory_space<semaphore_mem>>
    tpu.wait_dma2 semaphore(%57 : memref<!tpu.dma_semaphore, #tpu.memory_space<semaphore_mem>>) src(%53 : memref<8x128xf32, #tpu.memory_space<vmem>>) dst(%55 : memref<8x128xf32, #tpu.memory_space<any>>)
    return
  }
  func.func @transform_0(%arg0: i32) -> (i32, i32) {
    %c0_i32 = arith.constant 0 : i32
    %c0_i32_0 = arith.constant 0 : i32
    %c0_i32_1 = arith.constant 0 : i32
    return %c0_i32, %c0_i32_0 : i32, i32
  }
}

</mosaic_0001>

<bundles_post_ra>
// kernel: tpu_custom_call.1
= control target key start
LH: loop header
LB: loop body
LE: loop exit
PB: predicated region body
PF: predicated region fallthrough
CT: control target
= control target key end

     0   :  { %6 = vsyncpa [#allocation4], 0  ;;  %s438_s6 = smov 0   ;;  %s590_s0 = inlined_call_operand.hbm [shape: f32[31,128], index: 0, kind: input, shape index: {}]   ;;  %s591_s1 = inlined_call_operand.hbm [shape: f32[8,8,128], index: 1, kind: output, shape index: {}]  }
   0x1 LB: > { %s425_s7 = smov [#allocation3]   ;;  %s204_s9 = sadd.s32 4294967295, %s423_s6   ;;  %s423_s6 = sphi %s438_s6, %s12_s6  }
   0x2   : > { %s40_s8 = sshll.u32 %s425_s7, 4  ;;  %p249_p0 = scmp.ge.s32.totalorder %s423_s6, 1  ;;  %s445_s8 = int_to_ptr.vmem [resolvable:$true] %s40_s8 }
   0x3   : > { %p250_p1 = scmp.eq.s32.totalorder %s204_s9, 0  ;;  %s456_s11 = scalar_lea.vmem %s445_s8, 512 }
   0x4   : > { %p276_p4 = scmp.ne.s32.totalorder %s445_s8, %s456_s11  ;;  %p283_p7 = scmp.lt.s32.totalorder %s445_s8, %s445_s8 }
   0x5   : > { %p449_p2 = pnand %p250_p1, %p249_p0  ;;  %p284_p8 = scmp.lt.s32.totalorder %s456_s11, %s456_s11 }
   0x7   : > { %p235_p3 = pneg %p449_p2  ;;  %p285_p9 = por %p284_p8, %p283_p7 }
   0x9   : > { %p278_p5 = pnand %p276_p4, %p235_p3 }
   0xb   : > { %p279_p6 = pneg %p278_p5 }
   0xd   : > { %p286_p10 = pnand %p285_p9, %p279_p6 }
   0xf   : > { %289 = shalt.err (!%p286_p10)
}
  0x10   : > { %s426_s12 = smov 128   ;;  %s427_s13 = smov 8  }
  0x11   : > { %236 = dma.hbm_to_vmem [thread:$0]  (!%p449_p2), %s590_s0, 512, %s445_s8, [#allocation4], %s426_s12, %s426_s12, %s427_s13  }
  0x12   : > { %402 = dma.done.wait (%p235_p3), [#allocation4], 512  }
  0x13   : > { %404 = vsyncadd (%p235_p3), [#allocation4], 4294966784  ;;  %s479_s16 = sshll.u32 %s204_s9, 2  ;;  %s225_s17 = sshll.u32 %s204_s9, 9 }
  0x14   : > { %s63_s18 = ssub.s32 15, %s479_s16  ;;  %s485_s21 = scalar_lea.hbm %s591_s1, %s225_s17 }
  0x15   : > { %s79_s22 = ssub.s32 14, %s479_s16  ;;  %s64_s23 = scalar_lea.vmem [#allocation3], %s63_s18 }
  0x16   : > { %s75_s24 = sshll.u32 %s64_s23, 4  ;;  %s489_s25 = scalar_lea.hbm %s485_s21, 128  ;;  %s76_s24 = int_to_ptr.vmem [resolvable:$true] %s75_s24 }
  0x17   : > { %s290_s26 = scalar_lea.vmem %s76_s24, 128  ;;  %p297_p1 = scmp.lt.s32.totalorder %s76_s24, %s445_s8 }
  0x18   : > { %p291_p11 = scmp.ne.s32.totalorder %s76_s24, %s290_s26  ;;  %p298_p2 = scmp.lt.s32.totalorder %s456_s11, %s290_s26 }
  0x1a   : > { %p292_p12 = pnand %p291_p11, %p249_p0  ;;  %p299_p3 = por %p298_p2, %p297_p1 }
  0x1c   : > { %p293_p13 = pneg %p292_p12 }
  0x1e   : > { %p300_p4 = pnand %p299_p3, %p293_p13 }
  0x20   : > { %303 = shalt.err (!%p300_p4)  }
  0x21   : > { %p305_p5 = scmp.ne.s32.totalorder %s485_s21, %s489_s25  ;;  %s502_s29 = scalar_lea.hbm %s591_s1, 1024 }
  0x22   : > { %p309_p8 = scmp.lt.s32.totalorder %s485_s21, %s591_s1  ;;  %p310_p9 = scmp.lt.s32.totalorder %s502_s29, %s489_s25 }
  0x23   : > { %p306_p6 = pnand %p305_p5, %p249_p0 }
  0x24   : > { %p311_p10 = por %p310_p9, %p309_p8 }
  0x25   : > { %p307_p7 = pneg %p306_p6 }
  0x27   : > { %p312_p11 = pnand %p311_p10, %p307_p7 }
  0x29   : > { %315 = shalt.err (!%p312_p11)  }
  0x2a   : > { %241 = dma.vmem_to_hbm [thread:$0]  (%p249_p0), %s76_s24, 128, %s485_s21, [#allocation2] }
  0x2b   : > { %s81_s3 = scalar_lea.vmem [#allocation3], %s79_s22  ;;  %s97_s5 = ssub.s32 13, %s479_s16 }
  0x2c   : > { %s93_s4 = sshll.u32 %s81_s3, 4  ;;  %s94_s4 = int_to_ptr.vmem [resolvable:$true] %s93_s4 }
  0x2d   : > { %s316_s7 = scalar_lea.vmem %s94_s4, 128  ;;  %p323_p2 = scmp.lt.s32.totalorder %s94_s4, %s445_s8 }
  0x2e   : > { %p317_p12 = scmp.ne.s32.totalorder %s94_s4, %s316_s7  ;;  %p324_p3 = scmp.lt.s32.totalorder %s456_s11, %s316_s7 }
  0x30   : > { %p318_p13 = pnand %p317_p12, %p249_p0  ;;  %p325_p4 = por %p324_p3, %p323_p2 }
  0x32   : > { %p319_p1 = pneg %p318_p13 }
  0x34   : > { %p326_p5 = pnand %p325_p4, %p319_p1 }
  0x36   : > { %329 = shalt.err (!%p326_p5)  }
  0x37   : > { %s519_s9 = scalar_lea.hbm %s485_s21, 256  ;;  %p335_p9 = scmp.lt.s32.totalorder %s489_s25, %s591_s1 }
  0x38   : > { %p331_p6 = scmp.ne.s32.totalorder %s489_s25, %s519_s9  ;;  %p336_p10 = scmp.lt.s32.totalorder %s502_s29, %s519_s9 }
  0x3a   : > { %p332_p7 = pnand %p331_p6, %p249_p0  ;;  %p337_p11 = por %p336_p10, %p335_p9 }
  0x3c   : > { %p333_p8 = pneg %p332_p7 }
  0x3e   : > { %p338_p12 = pnand %p337_p11, %p333_p8 }
  0x40   : > { %341 = shalt.err (!%p338_p12)  }
  0x41   : > { %242 = dma.vmem_to_hbm [thread:$0]  (%p249_p0), %s94_s4, 128, %s489_s25, [#allocation2 + $0x1] }
  0x42   : > { %s99_s13 = scalar_lea.vmem [#allocation3], %s97_s5  ;;  %s115_s15 = ssub.s32 12, %s479_s16 }
  0x43   : > { %s111_s14 = sshll.u32 %s99_s13, 4  ;;  %s112_s14 = int_to_ptr.vmem [resolvable:$true] %s111_s14 }
  0x44   : > { %s343_s17 = scalar_lea.vmem %s112_s14, 128  ;;  %p350_p3 = scmp.lt.s32.totalorder %s112_s14, %s445_s8 }
  0x45   : > { %p344_p13 = scmp.ne.s32.totalorder %s112_s14, %s343_s17  ;;  %p351_p4 = scmp.lt.s32.totalorder %s456_s11, %s343_s17 }
  0x47   : > { %p345_p1 = pnand %p344_p13, %p249_p0  ;;  %p352_p5 = por %p351_p4, %p350_p3 }
  0x49   : > { %p346_p2 = pneg %p345_p1 }
  0x4b   : > { %p353_p6 = pnand %p352_p5, %p346_p2 }
  0x4d   : > { %356 = shalt.err (!%p353_p6)  }
  0x4e   : > { %s540_s18 = scalar_lea.hbm %s485_s21, 384  ;;  %p362_p10 = scmp.lt.s32.totalorder %s519_s9, %s591_s1 }
  0x4f   : > { %p358_p7 = scmp.ne.s32.totalorder %s519_s9, %s540_s18  ;;  %p363_p11 = scmp.lt.s32.totalorder %s502_s29, %s540_s18 }
  0x51   : > { %p359_p8 = pnand %p358_p7, %p249_p0  ;;  %p364_p12 = por %p363_p11, %p362_p10 }
  0x53   : > { %p360_p9 = pneg %p359_p8 }
  0x55   : > { %p365_p13 = pnand %p364_p12, %p360_p9 }
  0x57   : > { %368 = shalt.err (!%p365_p13)  }
  0x58   : > { %243 = dma.vmem_to_hbm [thread:$0]  (%p249_p0), %s112_s14, 128, %s519_s9, [#allocation2 + $0x2] }
  0x59   : > { %s117_s20 = scalar_lea.vmem [#allocation3], %s115_s15 }
  0x5a   : > { %s129_s22 = sshll.u32 %s117_s20, 4  ;;  %s130_s22 = int_to_ptr.vmem [resolvable:$true] %s129_s22 }
  0x5b   : > { %s370_s23 = scalar_lea.vmem %s130_s22, 128  ;;  %p377_p4 = scmp.lt.s32.totalorder %s130_s22, %s445_s8 }
  0x5c   : > { %p371_p1 = scmp.ne.s32.totalorder %s130_s22, %s370_s23  ;;  %p378_p5 = scmp.lt.s32.totalorder %s456_s11, %s370_s23 }
  0x5e   : > { %p372_p2 = pnand %p371_p1, %p249_p0  ;;  %p379_p6 = por %p378_p5, %p377_p4 }
  0x60   : > { %p373_p3 = pneg %p372_p2 }
  0x62   : > { %p380_p7 = pnand %p379_p6, %p373_p3 }
  0x64   : > { %383 = shalt.err (!%p380_p7)  }
  0x65   : > { %s396_s24 = scalar_lea.hbm %s485_s21, 512  ;;  %p389_p11 = scmp.lt.s32.totalorder %s540_s18, %s591_s1 }
  0x66   : > { %p385_p8 = scmp.ne.s32.totalorder %s540_s18, %s396_s24  ;;  %p390_p12 = scmp.lt.s32.totalorder %s502_s29, %s396_s24 }
  0x68   : > { %p386_p9 = pnand %p385_p8, %p249_p0  ;;  %p391_p13 = por %p390_p12, %p389_p11 }
  0x6a   : > { %p387_p10 = pneg %p386_p9 }
  0x6c   : > { %p392_p1 = pnand %p391_p13, %p387_p10 }
  0x6e   : > { %395 = shalt.err (!%p392_p1)  }
  0x6f   : > { %244 = dma.vmem_to_hbm [thread:$0]  (%p249_p0), %s130_s22, 128, %s540_s18, [#allocation2 + $0x3] }
  0x70   : > { %406 = dma.done.wait (%p249_p0), [#allocation2], 128 }
  0x71   : > { %408 = vsyncadd (%p249_p0), [#allocation2], 4294967168 }
  0x72   : > { %410 = dma.done.wait (%p249_p0), [#allocation2 + $0x1], 128 }
  0x73   : > { %412 = vsyncadd (%p249_p0), [#allocation2 + $0x1], 4294967168 }
  0x74   : > { %414 = dma.done.wait (%p249_p0), [#allocation2 + $0x2], 128 }
  0x75   : > { %416 = vsyncadd (%p249_p0), [#allocation2 + $0x2], 4294967168 }
  0x76   : > { %418 = dma.done.wait (%p249_p0), [#allocation2 + $0x3], 128 }
  0x77   : > { %420 = vsyncadd (%p249_p0), [#allocation2 + $0x3], 4294967168  ;;  %s12_s6 = sadd.s32 1, %s423_s6  }
  0x78   : > { %p9_p2 = scmp.ge.s32.totalorder %s12_s6, 3  }
  0x7a   :  { %11 = sbr.rel (!%p9_p2) target bundleno = 1 (0x1), region = 70 }
  0x7f   :  { %142 = vsyncpa [#allocation4], 1 }
  0x80   :  { %144 = vsyncpa [#allocation4 + $0x1], 1 }
  0x81   :  { %145 = vsyncmov [#allocation2] }
  0x84   :  { %s146_s8 = vpop.sfrf %145 }
  0x85   :  { %p220_p3 = scmp.ne.s32.totalorder %s146_s8, 0 }
  0x87   :  { %150 = shalt.err (%p220_p3)  }
  0x88   :  { %152 = vsyncmov [#allocation2 + $0x1] }
  0x8b   :  { %s153_s11 = vpop.sfrf %152 }
  0x8c   :  { %p221_p4 = scmp.ne.s32.totalorder %s153_s11, 0 }
  0x8e   :  { %157 = shalt.err (%p221_p4)  }
  0x8f   :  { %159 = vsyncmov [#allocation2 + $0x2] }
  0x92   :  { %s160_s21 = vpop.sfrf %159 }
  0x93   :  { %p222_p5 = scmp.ne.s32.totalorder %s160_s21, 0 }
  0x95   :  { %164 = shalt.err (%p222_p5)  }
  0x96   :  { %166 = vsyncmov [#allocation2 + $0x3] }
  0x99   :  { %s167_s27 = vpop.sfrf %166 }
  0x9a   :  { %p223_p0 = scmp.ne.s32.totalorder %s167_s27, 0 }
  0x9c   :  { %171 = shalt.err (%p223_p0)  }

</bundles_post_ra>
